<compile_context>
chip_gen: v7x
topology: tpu7x:2x2x1
jax: 0.10.0
libtpu: 0.0.40
codegen_flags: <defaults>
</compile_context>

<pallas_src>
import jax
import jax.numpy as jnp
from jax.experimental import pallas as pl
from jax.experimental.pallas import tpu as pltpu


# ---------------------------------------------------------------------------
# Pallas kernel
# ---------------------------------------------------------------------------
def _make_kernel(hidden, C, gate_dtype):
    def wn_coupling_kernel(x0_ref, sp_ref, x1_ref,
                           w_pre_x_ref, w_pre_sp_ref, b_pre_ref,
                           w_end_ref, b_end_ref,
                           out_ref):
        # Fused pre-gate matmul: (start conv ∘ in-layer conv) on x0 plus the
        # conditioning conv on spect; bias kept as a separate f32 add so it is
        # never quantized into bf16 weights.
        a = (jnp.dot(w_pre_x_ref[...], x0_ref[...],
                     preferred_element_type=jnp.float32)
             + jnp.dot(w_pre_sp_ref[...], sp_ref[...],
                       preferred_element_type=jnp.float32)
             + b_pre_ref[...])                                  # (2*hidden, TN) f32

        # Gated nonlinearity.  gate_dtype=bf16 on v6e/v7x doubles EUP throughput
        # (the saturating unit there); keep f32 on v5e.
        a = a.astype(gate_dtype)
        gate = jnp.tanh(a[:hidden, :]) * jax.nn.sigmoid(a[hidden:, :])
        gate = gate.astype(w_end_ref.dtype)                     # MXU operand dtype

        # Merged end conv: rows 0:C -> log_s, rows C:2C -> t.
        pre = (jnp.dot(w_end_ref[...], gate,
                       preferred_element_type=jnp.float32)
               + b_end_ref[...])                                # (2C, TN) f32
        log_s = pre[:C, :]
        t = pre[C:, :]
        s = jnp.exp(log_s.astype(gate_dtype)).astype(jnp.float32)

        # Single (2C, TN) output block: full-vreg, one writeback DMA per tile.
        out_ref[0:C, :] = log_s
        out_ref[C:2 * C, :] = x1_ref[...] * s + t

    return wn_coupling_kernel


# ---------------------------------------------------------------------------
# Helpers
# ---------------------------------------------------------------------------
def _round_up(x, m):
    return (x + m - 1) // m * m


def _choose_tile(n, tile_n, min_steps):
    """Lane-tile: as big as tile_n allows, multiple of 128, no pad round-trip;
    capped so big problems keep >= min_steps grid steps (v7x has 2 TCs)."""
    n128 = _round_up(n, 128)
    tile = min(max(128, (tile_n // 128) * 128), n128)
    if n128 // 128 >= min_steps:
        tile = min(tile, _round_up(-(-n // min_steps), 128))
    return tile


def fuse_params(params):
    """Exact algebraic fusion of start/in/cond convs (done once, in the wrapper)."""
    (w_start, b_start, w_cond, b_cond, w_in, b_in, w_end, b_end) = params
    w_pre_x = (w_start @ w_in).T                  # (2*hidden, C)
    w_pre_sp = w_cond.T                           # (2*hidden, C_mel)
    b_pre = (b_start @ w_in + b_in + b_cond).T    # (2*hidden, 1)  -- stays f32
    w_end2 = w_end.T                              # (2C, hidden)
    b_end2 = b_end.T                              # (2C, 1)        -- stays f32
    return (w_pre_x, w_pre_sp, b_pre, w_end2, b_end2)


# ---------------------------------------------------------------------------
# (C, N)-layout entry point (use this across coupling blocks to avoid plumbing)
# ---------------------------------------------------------------------------
def affine_coupling_forward_cn(x0_cn, x1_cn, sp_cn, fused, *, tile_n=8192,
                               acts_dtype=jnp.float32, gate_dtype=jnp.float32,
                               min_grid_steps=8, vmem_limit_bytes=None):
    """x0_cn/x1_cn: (C, N), sp_cn: (C_mel, N); returns (x1_out_cn, log_s_cn)."""
    w_pre_x, w_pre_sp, b_pre, w_end2, b_end2 = fused
    C, N = x0_cn.shape
    C_mel = sp_cn.shape[0]
    hidden = w_pre_x.shape[0] // 2
    C2 = 2 * C

    # MXU operand dtype (bf16 fine on v5e/v6e/v7x); coupling math / biases stay f32.
    x0 = x0_cn.astype(acts_dtype)
    sp = sp_cn.astype(acts_dtype)
    x1 = x1_cn.astype(jnp.float32)
    w_pre_x = w_pre_x.astype(acts_dtype)
    w_pre_sp = w_pre_sp.astype(acts_dtype)
    w_end2 = w_end2.astype(acts_dtype)
    b_pre = b_pre.astype(jnp.float32)
    b_end2 = b_end2.astype(jnp.float32)

    tile = _choose_tile(N, tile_n, min_grid_steps)
    grid = (pl.cdiv(N, tile),)

    kernel = _make_kernel(hidden, C, gate_dtype)
    full = lambda i: (0, 0)
    col = lambda i: (0, i)

    out = pl.pallas_call(
        kernel,
        out_shape=jax.ShapeDtypeStruct((C2, N), jnp.float32),
        grid=grid,
        in_specs=[
            pl.BlockSpec((C, tile), col),              # x0      (streamed)
            pl.BlockSpec((C_mel, tile), col),          # spect   (streamed)
            pl.BlockSpec((C, tile), col),              # x1      (streamed)
            pl.BlockSpec((2 * hidden, C), full),       # w_pre_x (resident)
            pl.BlockSpec((2 * hidden, C_mel), full),   # w_pre_sp
            pl.BlockSpec((2 * hidden, 1), full),       # b_pre (f32)
            pl.BlockSpec((C2, hidden), full),          # w_end
            pl.BlockSpec((C2, 1), full),               # b_end (f32)
        ],
        out_specs=pl.BlockSpec((C2, tile), col),       # [log_s ; x1_out]
        compiler_params=pltpu.CompilerParams(
            dimension_semantics=("parallel",),
            vmem_limit_bytes=vmem_limit_bytes),
    )(x0, sp, x1, w_pre_x, w_pre_sp, b_pre, w_end2, b_end2)

    log_s_cn = out[:C, :]
    x1_out_cn = out[C:, :]
    return x1_out_cn, log_s_cn


# ---------------------------------------------------------------------------
# NCHW wrapper (matches the PyTorch module's forward interface, group_dim=2)
# ---------------------------------------------------------------------------
def affine_coupling_forward(z, spect, speaker_ids, params, *, tile_n=8192,
                            acts_dtype=jnp.float32, gate_dtype=jnp.float32):
    """z: (B, C, H, W) NCHW; spect: (B, C_mel, H//2, W). speaker_ids unused
    by this synthetic WN (as in many WaveFlow configs)."""
    del speaker_ids
    B, C, H, W = z.shape
    H2 = H // 2

    audio_0 = z[:, :, :H2, :]                 # passed through unchanged
    audio_1 = z[:, :, H2:, :]

    # TODO(synk): for multi-block flows keep activations in the (C, N) layout and
    # call affine_coupling_forward_cn directly; these moveaxis/reshape/concat ops
    # are HBM plumbing outside the kernel.
    def to_cn(x):
        return jnp.moveaxis(x, 1, 0).reshape(x.shape[1], -1)

    x0_cn = to_cn(audio_0)                    # (C, N),     N = B*H2*W
    x1_cn = to_cn(audio_1)                    # (C, N)
    sp_cn = to_cn(spect)                      # (C_mel, N)

    fused = fuse_params(params)
    x1_out_cn, log_s_cn = affine_coupling_forward_cn(
        x0_cn, x1_cn, sp_cn, fused, tile_n=tile_n,
        acts_dtype=acts_dtype, gate_dtype=gate_dtype)

    def from_cn(x):
        return jnp.moveaxis(x.reshape(C, B, H2, W), 0, 1)

    audio_1_out = from_cn(x1_out_cn)
    log_s = from_cn(log_s_cn)
    audio_out = jnp.concatenate([audio_0, audio_1_out], axis=2)   # group_dim == 2
    return audio_out, log_s


# ---------------------------------------------------------------------------
# Pure-JAX reference (un-fused, mirrors the PyTorch forward semantics)
# ---------------------------------------------------------------------------
def reference_forward(z, spect, params):
    B, C, H, W = z.shape
    H2 = H // 2
    audio_0, audio_1 = z[:, :, :H2, :], z[:, :, H2:, :]
    (w_start, b_start, w_cond, b_cond, w_in, b_in, w_end, b_end) = params
    hidden = w_start.shape[1]

    to_flat = lambda x: jnp.transpose(x, (0, 2, 3, 1)).reshape(-1, x.shape[1])
    x0, x1, sp = to_flat(audio_0), to_flat(audio_1), to_flat(spect)

    h = x0 @ w_start + b_start
    cond = sp @ w_cond + b_cond
    a = h @ w_in + b_in + cond
    gate = jnp.tanh(a[:, :hidden]) * jax.nn.sigmoid(a[:, hidden:])
    out = gate @ w_end + b_end
    log_s, t = out[:, :C], out[:, C:]
    x1_out = x1 * jnp.exp(log_s) + t

    from_flat = lambda x: jnp.transpose(x.reshape(B, H2, W, C), (0, 3, 1, 2))
    audio_out = jnp.concatenate([audio_0, from_flat(x1_out)], axis=2)
    return audio_out, from_flat(log_s)


def init_params(key, C, C_mel, hidden):
    ks = jax.random.split(key, 8)
    scale = 0.1
    w_start = scale * jax.random.normal(ks[0], (C, hidden), jnp.float32)
    b_start = scale * jax.random.normal(ks[1], (1, hidden), jnp.float32)
    w_cond = scale * jax.random.normal(ks[2], (C_mel, 2 * hidden), jnp.float32)
    b_cond = scale * jax.random.normal(ks[3], (1, 2 * hidden), jnp.float32)
    w_in = scale * jax.random.normal(ks[4], (hidden, 2 * hidden), jnp.float32)
    b_in = scale * jax.random.normal(ks[5], (1, 2 * hidden), jnp.float32)
    w_end = scale * jax.random.normal(ks[6], (hidden, 2 * C), jnp.float32)
    b_end = scale * jax.random.normal(ks[7], (1, 2 * C), jnp.float32)
    return (w_start, b_start, w_cond, b_cond, w_in, b_in, w_end, b_end)


if __name__ == "__main__":
    key = jax.random.PRNGKey(0)
    k_z, k_sp, k_p = jax.random.split(key, 3)

    B, C, H, W = 2, 4, 16, 16          # z in NCHW; split along H (group_dim=2)
    C_mel, hidden = 8, 32
    H2 = H // 2

    z = jax.random.normal(k_z, (B, C, H, W), jnp.float32)
    spect = jax.random.normal(k_sp, (B, C_mel, H2, W), jnp.float32)
    speaker_ids = None
    params = init_params(k_p, C, C_mel, hidden)

    # f32 path (v5e-safe default): tight check against the un-fused reference.
    audio_out, log_s = jax.block_until_ready(
        affine_coupling_forward(z, spect, speaker_ids, params))
    ref_audio_out, ref_log_s = reference_forward(z, spect, params)

    assert audio_out.shape == (B, C, H, W)
    assert log_s.shape == (B, C, H2, W)
    assert jnp.allclose(audio_out, ref_audio_out, atol=1e-4, rtol=1e-4)
    assert jnp.allclose(log_s, ref_log_s, atol=1e-4, rtol=1e-4)

    # Fast path: bf16 MXU operands (valid on v5e/v6e/v7x) + bf16 transcendentals
    # (the v6e/v7x EUP win).  Loose tolerance vs the f32 reference.
    audio_out_bf, log_s_bf = jax.block_until_ready(
        affine_coupling_forward(z, spect, speaker_ids, params,
                                acts_dtype=jnp.bfloat16,
                                gate_dtype=jnp.bfloat16))
    assert jnp.allclose(audio_out_bf, ref_audio_out, atol=1e-1, rtol=1e-1)
    assert jnp.allclose(log_s_bf, ref_log_s, atol=1e-1, rtol=1e-1)

    print("KERNEL_OK")
</pallas_src>

<mosaic_0001>
module attributes {stable_mosaic.version = 11 : i64} {
  func.func @wn_coupling_kernel(%arg0: i32, %arg1: memref<4x256xf32, #tpu.memory_space<vmem>>, %arg2: memref<8x256xf32, #tpu.memory_space<vmem>>, %arg3: memref<4x256xf32, #tpu.memory_space<vmem>>, %arg4: memref<64x4xf32, #tpu.memory_space<vmem>>, %arg5: memref<64x8xf32, #tpu.memory_space<vmem>>, %arg6: memref<64x1xf32, #tpu.memory_space<vmem>>, %arg7: memref<8x32xf32, #tpu.memory_space<vmem>>, %arg8: memref<8x1xf32, #tpu.memory_space<vmem>>, %arg9: memref<8x256xf32, #tpu.memory_space<vmem>>) attributes {dimension_semantics = [#tpu.dimension_semantics<parallel>], iteration_bounds = array<i64: 1>, scalar_prefetch = 0 : i64, scratch_operands = 0 : i64, tpu.core_type = #tpu.core_type<tc>, window_params = [{transform_indices = @transform_0, window_bounds = array<i64: 4, 256>}, {transform_indices = @transform_1, window_bounds = array<i64: 8, 256>}, {transform_indices = @transform_2, window_bounds = array<i64: 4, 256>}, {pipeline_mode = #tpu.pipeline_mode<synchronous>, transform_indices = @transform_3, window_bounds = array<i64: 64, 4>}, {pipeline_mode = #tpu.pipeline_mode<synchronous>, transform_indices = @transform_4, window_bounds = array<i64: 64, 8>}, {pipeline_mode = #tpu.pipeline_mode<synchronous>, transform_indices = @transform_5, window_bounds = array<i64: 64, 1>}, {pipeline_mode = #tpu.pipeline_mode<synchronous>, transform_indices = @transform_6, window_bounds = array<i64: 8, 32>}, {pipeline_mode = #tpu.pipeline_mode<synchronous>, transform_indices = @transform_7, window_bounds = array<i64: 8, 1>}, {transform_indices = @transform_8, window_bounds = array<i64: 8, 256>}]} {
    %c0 = arith.constant 0 : index
    %c0_0 = arith.constant 0 : index
    %0 = vector.load %arg4[%c0, %c0_0] : memref<64x4xf32, #tpu.memory_space<vmem>>, vector<64x4xf32>
    %c0_1 = arith.constant 0 : index
    %c0_2 = arith.constant 0 : index
    %1 = vector.load %arg1[%c0_1, %c0_2] : memref<4x256xf32, #tpu.memory_space<vmem>>, vector<4x256xf32>
    %cst = arith.constant dense<0.000000e+00> : vector<64x256xf32>
    %2 = tpu.matmul %0, %1, %cst {dimension_numbers = #tpu.dot_dimension_numbers<[1], [0], [0], [1], [0, 0, 1, 1], [], []>} : vector<64x4xf32>, vector<4x256xf32>, vector<64x256xf32> -> vector<64x256xf32>
    %c0_3 = arith.constant 0 : index
    %c0_4 = arith.constant 0 : index
    %3 = vector.load %arg5[%c0_3, %c0_4] : memref<64x8xf32, #tpu.memory_space<vmem>>, vector<64x8xf32>
    %c0_5 = arith.constant 0 : index
    %c0_6 = arith.constant 0 : index
    %4 = vector.load %arg2[%c0_5, %c0_6] : memref<8x256xf32, #tpu.memory_space<vmem>>, vector<8x256xf32>
    %cst_7 = arith.constant dense<0.000000e+00> : vector<64x256xf32>
    %5 = tpu.matmul %3, %4, %cst_7 {dimension_numbers = #tpu.dot_dimension_numbers<[1], [0], [0], [1], [0, 0, 1, 1], [], []>} : vector<64x8xf32>, vector<8x256xf32>, vector<64x256xf32> -> vector<64x256xf32>
    %6 = arith.addf %2, %5 : vector<64x256xf32>
    %c0_8 = arith.constant 0 : index
    %c0_9 = arith.constant 0 : index
    %7 = vector.load %arg6[%c0_8, %c0_9] : memref<64x1xf32, #tpu.memory_space<vmem>>, vector<64x1xf32>
    %8 = vector.broadcast %7 : vector<64x1xf32> to vector<64x256xf32>
    %9 = arith.addf %6, %8 : vector<64x256xf32>
    %10 = vector.extract_strided_slice %9 {offsets = [0, 0], sizes = [32, 256], strides = [1, 1]} : vector<64x256xf32> to vector<32x256xf32>
    %11 = math.tanh %10 : vector<32x256xf32>
    %12 = vector.extract_strided_slice %9 {offsets = [32, 0], sizes = [32, 256], strides = [1, 1]} : vector<64x256xf32> to vector<32x256xf32>
    %13 = arith.negf %12 : vector<32x256xf32>
    %14 = math.exp %13 : vector<32x256xf32>
    %cst_10 = arith.constant 1.000000e+00 : f32
    %15 = vector.broadcast %cst_10 : f32 to vector<32x256xf32>
    %16 = arith.addf %15, %14 : vector<32x256xf32>
    %17 = arith.divf %15, %16 : vector<32x256xf32>
    %18 = arith.mulf %11, %17 : vector<32x256xf32>
    %c0_11 = arith.constant 0 : index
    %c0_12 = arith.constant 0 : index
    %19 = vector.load %arg7[%c0_11, %c0_12] : memref<8x32xf32, #tpu.memory_space<vmem>>, vector<8x32xf32>
    %cst_13 = arith.constant dense<0.000000e+00> : vector<8x256xf32>
    %20 = tpu.matmul %19, %18, %cst_13 {dimension_numbers = #tpu.dot_dimension_numbers<[1], [0], [0], [1], [0, 0, 1, 1], [], []>} : vector<8x32xf32>, vector<32x256xf32>, vector<8x256xf32> -> vector<8x256xf32>
    %c0_14 = arith.constant 0 : index
    %c0_15 = arith.constant 0 : index
    %21 = vector.load %arg8[%c0_14, %c0_15] : memref<8x1xf32, #tpu.memory_space<vmem>>, vector<8x1xf32>
    %22 = vector.broadcast %21 : vector<8x1xf32> to vector<8x256xf32>
    %23 = arith.addf %20, %22 : vector<8x256xf32>
    %24 = vector.extract_strided_slice %23 {offsets = [0, 0], sizes = [4, 256], strides = [1, 1]} : vector<8x256xf32> to vector<4x256xf32>
    %25 = vector.extract_strided_slice %23 {offsets = [4, 0], sizes = [4, 256], strides = [1, 1]} : vector<8x256xf32> to vector<4x256xf32>
    %26 = math.exp %24 : vector<4x256xf32>
    %c0_16 = arith.constant 0 : index
    %c0_17 = arith.constant 0 : index
    %27 = vector.load %arg9[%c0_16, %c0_17] : memref<8x256xf32, #tpu.memory_space<vmem>>, vector<4x256xf32>
    tpu.vector_store %arg9[%c0_16, %c0_17], %24 {strides = array<i32>} : memref<8x256xf32, #tpu.memory_space<vmem>>, vector<4x256xf32>,
    %c0_18 = arith.constant 0 : index
    %c0_19 = arith.constant 0 : index
    %28 = vector.load %arg3[%c0_18, %c0_19] : memref<4x256xf32, #tpu.memory_space<vmem>>, vector<4x256xf32>
    %29 = arith.mulf %28, %26 : vector<4x256xf32>
    %30 = arith.addf %29, %25 : vector<4x256xf32>
    %c4 = arith.constant 4 : index
    %c0_20 = arith.constant 0 : index
    %31 = vector.load %arg9[%c4, %c0_20] : memref<8x256xf32, #tpu.memory_space<vmem>>, vector<4x256xf32>
    tpu.vector_store %arg9[%c4, %c0_20], %30 {strides = array<i32>} : memref<8x256xf32, #tpu.memory_space<vmem>>, vector<4x256xf32>,
    return
  }
  func.func @transform_0(%arg0: i32) -> (i32, i32) {
    %c0_i32 = arith.constant 0 : i32
    %c0_i32_0 = arith.constant 0 : i32
    return %c0_i32, %arg0 : i32, i32
  }
  func.func @transform_1(%arg0: i32) -> (i32, i32) {
    %c0_i32 = arith.constant 0 : i32
    %c0_i32_0 = arith.constant 0 : i32
    return %c0_i32, %arg0 : i32, i32
  }
  func.func @transform_2(%arg0: i32) -> (i32, i32) {
    %c0_i32 = arith.constant 0 : i32
    %c0_i32_0 = arith.constant 0 : i32
    return %c0_i32, %arg0 : i32, i32
  }
  func.func @transform_3(%arg0: i32) -> (i32, i32) {
    %c0_i32 = arith.constant 0 : i32
    %c0_i32_0 = arith.constant 0 : i32
    %c0_i32_1 = arith.constant 0 : i32
    return %c0_i32, %c0_i32_0 : i32, i32
  }
  func.func @transform_4(%arg0: i32) -> (i32, i32) {
    %c0_i32 = arith.constant 0 : i32
    %c0_i32_0 = arith.constant 0 : i32
    %c0_i32_1 = arith.constant 0 : i32
    return %c0_i32, %c0_i32_0 : i32, i32
  }
  func.func @transform_5(%arg0: i32) -> (i32, i32) {
    %c0_i32 = arith.constant 0 : i32
    %c0_i32_0 = arith.constant 0 : i32
    %c0_i32_1 = arith.constant 0 : i32
    return %c0_i32, %c0_i32_0 : i32, i32
  }
  func.func @transform_6(%arg0: i32) -> (i32, i32) {
    %c0_i32 = arith.constant 0 : i32
    %c0_i32_0 = arith.constant 0 : i32
    %c0_i32_1 = arith.constant 0 : i32
    return %c0_i32, %c0_i32_0 : i32, i32
  }
  func.func @transform_7(%arg0: i32) -> (i32, i32) {
    %c0_i32 = arith.constant 0 : i32
    %c0_i32_0 = arith.constant 0 : i32
    %c0_i32_1 = arith.constant 0 : i32
    return %c0_i32, %c0_i32_0 : i32, i32
  }
  func.func @transform_8(%arg0: i32) -> (i32, i32) {
    %c0_i32 = arith.constant 0 : i32
    %c0_i32_0 = arith.constant 0 : i32
    return %c0_i32, %arg0 : i32, i32
  }
}

</mosaic_0001>

<bundles_post_ra>
// kernel: tpu_custom_call.1
= control target key start
LH: loop header
LB: loop body
LE: loop exit
PB: predicated region body
PF: predicated region fallthrough
CT: control target
= control target key end

     0   :  { %vm214_vm0 = vcmask 1043456   ;;  %vm49_vm1 = vcmask 64512   ;;  %v711_v3 = vmov 0.0   ;;  %vm189_vm2 = vcmask 31744   ;;  %s909_s0 = inlined_call_operand.vmem [shape: f32[4,256], index: 0, kind: input, shape index: {}]   ;;  %s910_s1 = inlined_call_operand.vmem [shape: f32[8,256], index: 1, kind: input, shape index: {}]   ;;  %s911_s2 = inlined_call_operand.vmem [shape: f32[4,256], index: 2, kind: input, shape index: {}]   ;;  %s912_s3 = inlined_call_operand.vmem [shape: f32[64,4], index: 3, kind: input, shape index: {}]   ;;  %s913_s4 = inlined_call_operand.vmem [shape: f32[64,8], index: 4, kind: input, shape index: {}]   ;;  %s914_s5 = inlined_call_operand.vmem [shape: f32[64,1], index: 5, kind: input, shape index: {}]   ;;  %s915_s6 = inlined_call_operand.vmem [shape: f32[8,32], index: 6, kind: input, shape index: {}]   ;;  %s916_s7 = inlined_call_operand.vmem [shape: f32[8,1], index: 7, kind: input, shape index: {}]   ;;  %s917_s8 = inlined_call_operand.hbm [shape: f32[8,256], index: 8, kind: output, shape index: {}]  }
   0x1   :  { %v48_v0 = vld [vmem:[%s910_s1 + $0x8] sm:$0xff]  ;;  %v47_v1 = vld [vmem:[%s910_s1] sm:$0xff]  ;;  %138 = vmatprep.mubr.f32.mxu1 %v711_v3  ;;  %283 = vmatprep.mubr.f32.mxu0 %v711_v3  ;;  %v712_v8 = vmov 0   ;;  %v338_v11 = vld [vmem:[%s914_s5 + $0x30] sm:$0xff] }
   0x2   :  { %v38_v2 = vld [vmem:[%s909_s0] sm:$0xff]  ;;  %74 = vmatprep.subr.mxu1 %v48_v0  ;;  %v40_v7 = vld [vmem:[%s913_s4 + $0x8] sm:$0xff]  ;;  %632 = vset.pattern.permute.xlu0 %v712_v8  ;;  %v41_v12 = vld [vmem:[%s913_s4 + $0x10] sm:$0xff] }
   0x3   :  { %v188_v4 = vcombine.high %v38_v2, %v38_v2  ;;  %v39_v5 = vld [vmem:[%s913_s4] sm:$0xff]  ;;  %75 = vmatpush1.msra.mxu1 %v47_v1  ;;  %v31_v9 = vld [vmem:[%s912_s3 + $0x8] sm:$0xff]  ;;  %633 = vset.pattern.permute.xlu1 %v712_v8  ;;  %v339_v14 = vld [vmem:[%s914_s5 + $0x38] sm:$0xff] }
   0x4   :  { %v30_v6 = vld [vmem:[%s912_s3] sm:$0xff]  ;;  %578 = vmatmul.mubr.msk.f32.vlgmr.msra.gmra.mrb[0].mxu1 %vm49_vm1, %v39_v5  ;;  %372 = vperm.xlu1 %633, %v338_v11   ;;  %v337_v13 = vld [vmem:[%s914_s5 + $0x28] sm:$0xff] }
   0x5   :  { %586 = vmatprep.subr.msk.mxu0 %vm214_vm0, %v188_v4  ;;  %144 = vmatprep.mubr.f32.mxu1 %v711_v3  ;;  %v336_v10 = vld [vmem:[%s914_s5 + $0x20] sm:$0xff] }
   0x6   :  { %587 = vmatpush1.msk.msra.mxu0 %vm214_vm0, %v38_v2  ;;  %362 = vperm.xlu0 %632, %v336_v10  }
   0x7   :  { %588 = vmatmul.mubr.msk.f32.vlgmr.msra.gmra.mrb[0].mxu0 %vm189_vm2, %v30_v6 }
   0x8   :  { %289 = vmatprep.mubr.f32.mxu0 %v711_v3  ;;  %579 = vmatmul.mubr.msk.f32.gmra.mrb[2].mxu1 %vm49_vm1, %v40_v7 }
   0x9   :  { %150 = vmatprep.mubr.f32.mxu1 %v711_v3 }
   0xb   :  { %589 = vmatmul.mubr.msk.f32.gmra.mrb[2].mxu0 %vm189_vm2, %v31_v9 }
   0xc   :  { %13 = vsyncpa [#allocation3], 0  ;;  %295 = vmatprep.mubr.f32.mxu0 %v711_v3  ;;  %v32_v15 = vld [vmem:[%s912_s3 + $0x10] sm:$0xff]  ;;  %580 = vmatmul.mubr.msk.f32.gmra.mrb[4].mxu1 %vm49_vm1, %v41_v12  ;;  %v42_v16 = vld [vmem:[%s913_s4 + $0x18] sm:$0xff]  ;;  %vm467_vm3 = vcmask 261120  }
   0xd   :  { %367 = vperm.xlu0 %632, %v337_v13   ;;  %156 = vmatprep.mubr.f32.mxu1 %v711_v3  ;;  %v332_v17 = vld [vmem:[%s914_s5] sm:$0xff]  ;;  %v333_v18 = vld [vmem:[%s914_s5 + $0x8] sm:$0xff]  ;;  %v33_v19 = vld [vmem:[%s912_s3 + $0x18] sm:$0xff] }
   0xe   :  { %377 = vperm.xlu1 %633, %v339_v14   ;;  %v43_v20 = vld [vmem:[%s913_s4 + $0x20] sm:$0xff]  ;;  %v334_v21 = vld [vmem:[%s914_s5 + $0x10] sm:$0xff]  ;;  %v335_v22 = vld [vmem:[%s914_s5 + $0x18] sm:$0xff] }
   0xf   :  { %590 = vmatmul.mubr.msk.f32.gmra.mrb[4].mxu0 %vm189_vm2, %v32_v15  ;;  %v34_v23 = vld [vmem:[%s912_s3 + $0x20] sm:$0xff]  ;;  %v44_v24 = vld [vmem:[%s913_s4 + $0x28] sm:$0xff]  ;;  %v45_v27 = vld [vmem:[%s913_s4 + $0x30] sm:$0xff] }
  0x10   :  { %301 = vmatprep.mubr.f32.mxu0 %v711_v3  ;;  %581 = vmatmul.mubr.msk.f32.gmra.mrb[6].mxu1 %vm49_vm1, %v42_v16  ;;  %v461_v25 = vld [vmem:[%s916_s7] sm:$0xff]  ;;  %v35_v26 = vld [vmem:[%s912_s3 + $0x28] sm:$0xff]  ;;  %v36_v28 = vld [vmem:[%s912_s3 + $0x30] sm:$0xff] }
  0x11   :  { %342 = vperm.xlu0 %632, %v332_v17   ;;  %162 = vmatprep.mubr.f32.mxu1 %v711_v3  ;;  %v46_v29 = vld [vmem:[%s913_s4 + $0x38] sm:$0xff] }
  0x12   :  { %347 = vperm.xlu1 %633, %v333_v18   ;;  %v37_v30 = vld [vmem:[%s912_s3 + $0x38] sm:$0xff] }
  0x13   :  { %591 = vmatmul.mubr.msk.f32.gmra.mrb[6].mxu0 %vm189_vm2, %v33_v19 }
  0x14   :  { %307 = vmatprep.mubr.f32.mxu0 %v711_v3  ;;  %582 = vmatmul.mubr.msk.f32.gmra.mrb[8].mxu1 %vm49_vm1, %v43_v20 }
  0x15   :  { %352 = vperm.xlu0 %632, %v334_v21   ;;  %168 = vmatprep.mubr.f32.mxu1 %v711_v3 }
  0x16   :  { %357 = vperm.xlu1 %633, %v335_v22  }
  0x17   :  { %592 = vmatmul.mubr.msk.f32.gmra.mrb[8].mxu0 %vm189_vm2, %v34_v23 }
  0x18   :  { %313 = vmatprep.mubr.f32.mxu0 %v711_v3  ;;  %583 = vmatmul.mubr.msk.f32.gmra.mrb[10].mxu1 %vm49_vm1, %v44_v24 }
  0x19   :  { %464 = vperm.xlu0 %632, %v461_v25   ;;  %174 = vmatprep.mubr.f32.mxu1 %v711_v3 }
  0x1b   :  { %593 = vmatmul.mubr.msk.f32.gmra.mrb[10].mxu0 %vm189_vm2, %v35_v26 }
  0x1c   :  { %319 = vmatprep.mubr.f32.mxu0 %v711_v3  ;;  %584 = vmatmul.mubr.msk.f32.gmra.mrb[12].mxu1 %vm49_vm1, %v45_v27 }
  0x1d   :  { %180 = vmatprep.mubr.f32.mxu1 %v711_v3 }
  0x1f   :  { %594 = vmatmul.mubr.msk.f32.gmra.mrb[12].mxu0 %vm189_vm2, %v36_v28 }
  0x20   :  { %325 = vmatprep.mubr.f32.mxu0 %v711_v3  ;;  %585 = vmatmul.mubr.msk.f32.gmra.mrb[14].mxu1 %vm49_vm1, %v46_v29 }
  0x21   :  { %535 = vmatprep.mubr.f32.mxu1 %v711_v3 }
  0x23   :  { %595 = vmatmul.mubr.msk.f32.gmra.mrb[14].mxu0 %vm189_vm2, %v37_v30 }
  0x83   :  { %v373_v57 = vpop.permute.xlu1 %372 }
  0x85   :  { %v363_v50 = vpop.permute.xlu0 %362 }
  0x8c   :  { %v368_v60 = vpop.permute.xlu0 %367 }
  0x8d   :  { %v378_v5 = vpop.permute.xlu1 %377 }
  0x90   :  { %v343_v12 = vpop.permute.xlu0 %342 }
  0x91   :  { %v348_v24 = vpop.permute.xlu1 %347 }
  0xd7   :  { %v140_v31 = vpop.f32.mrb[0].mxu1 }
  0xd8   :  { %v142_v32 = vpop.f32.mrb[1].mxu1 }
  0xda   :  { %v285_v33 = vpop.f32.mrb[0].mxu0 }
  0xdb   :  { %v286_v34 = vadd.f32 %v285_v33, %v140_v31  ;;  %v287_v35 = vpop.f32.mrb[1].mxu0  ;;  %v146_v37 = vpop.f32.mrb[2].mxu1 }
  0xdc   :  { %v288_v36 = vadd.f32 %v287_v35, %v142_v32  ;;  %v148_v38 = vpop.f32.mrb[3].mxu1 }
  0xdd   :  { %v380_v20 = vadd.f32 %v343_v12, %v286_v34 }
  0xde   :  { %v291_v39 = vpop.f32.mrb[2].mxu0  ;;  %v381_v29 = vadd.f32 %v343_v12, %v288_v36 }
  0xdf   :  { %v292_v40 = vadd.f32 %v291_v39, %v146_v37  ;;  %v293_v41 = vpop.f32.mrb[3].mxu0  ;;  %v152_v43 = vpop.f32.mrb[4].mxu1 }
  0xe0   :  { %v876_v42 = vadd.f32 %v293_v41, %v148_v38  ;;  %v154_v44 = vpop.f32.mrb[5].mxu1 }
  0xe1   :  { %v382_v33 = vadd.f32 %v348_v24, %v292_v40 }
  0xe2   :  { %v297_v45 = vpop.f32.mrb[4].mxu0  ;;  %v383_v36 = vadd.f32 %v348_v24, %v876_v42 }
  0xe3   :  { %v878_v46 = vadd.f32 %v297_v45, %v152_v43  ;;  %v299_v47 = vpop.f32.mrb[5].mxu0  ;;  %v158_v49 = vpop.f32.mrb[6].mxu1 }
  0xe4   :  { %v880_v48 = vadd.f32 %v299_v47, %v154_v44  ;;  %v160_v51 = vpop.f32.mrb[7].mxu1  ;;  %v353_v47 = vpop.permute.xlu0 %352 }
  0xe6   :  { %v303_v52 = vpop.f32.mrb[6].mxu0 }
  0xe7   :  { %v882_v53 = vadd.f32 %v303_v52, %v158_v49  ;;  %v305_v54 = vpop.f32.mrb[7].mxu0  ;;  %v164_v56 = vpop.f32.mrb[8].mxu1 }
  0xe8   :  { %v884_v55 = vadd.f32 %v305_v54, %v160_v51  ;;  %v166_v58 = vpop.f32.mrb[9].mxu1  ;;  %v384_v51 = vadd.f32 %v353_v47, %v878_v46  ;;  %v385_v54 = vadd.f32 %v353_v47, %v880_v48 }
  0xea   :  { %v309_v59 = vpop.f32.mrb[8].mxu0 }
  0xeb   :  { %v310_v61 = vadd.f32 %v309_v59, %v164_v56  ;;  %v311_v62 = vpop.f32.mrb[9].mxu0  ;;  %v170_v0 = vpop.f32.mrb[10].mxu1 }
  0xec   :  { %v312_v63 = vadd.f32 %v311_v62, %v166_v58  ;;  %v172_v2 = vpop.f32.mrb[11].mxu1  ;;  %v358_v58 = vpop.permute.xlu1 %357 }
  0xed   :  { %v388_v1 = vadd.f32 %v363_v50, %v310_v61  ;;  %v386_v62 = vadd.f32 %v358_v58, %v882_v53  ;;  %v387_v48 = vadd.f32 %v358_v58, %v884_v55 }
  0xee   :  { %v389_v3 = vadd.f32 %v363_v50, %v312_v63  ;;  %v315_v4 = vpop.f32.mrb[10].mxu0 }
  0xef   :  { %v596_v6 = vmul.f32 -1.442695, %v388_v1  ;;  %v316_v7 = vadd.f32 %v315_v4, %v170_v0  ;;  %v317_v8 = vpop.f32.mrb[11].mxu0  ;;  %v176_v11 = vpop.f32.mrb[12].mxu1 }
  0xf0   :  { %v597_v9 = vmul.f32 -1.442695, %v389_v3  ;;  %v318_v10 = vadd.f32 %v317_v8, %v172_v2  ;;  %v178_v14 = vpop.f32.mrb[13].mxu1 }
  0xf1   :  { %635 = vpow2.f32 %v596_v6  ;;  %v390_v13 = vadd.f32 %v368_v60, %v316_v7 }
  0xf2   :  { %637 = vpow2.f32 %v597_v9  ;;  %v391_v15 = vadd.f32 %v368_v60, %v318_v10  ;;  %v321_v16 = vpop.f32.mrb[12].mxu0 }
  0xf3   :  { %v598_v17 = vmul.f32 -1.442695, %v390_v13  ;;  %v322_v18 = vadd.f32 %v321_v16, %v176_v11  ;;  %v323_v19 = vpop.f32.mrb[13].mxu0  ;;  %v182_v23 = vpop.f32.mrb[14].mxu1 }
  0xf4   :  { %v599_v21 = vmul.f32 -1.442695, %v391_v15  ;;  %v324_v22 = vadd.f32 %v323_v19, %v178_v14  ;;  %v184_v26 = vpop.f32.mrb[15].mxu1 }
  0xf5   :  { %639 = vpow2.f32 %v598_v17  ;;  %v392_v25 = vadd.f32 %v373_v57, %v322_v18 }
  0xf6   :  { %641 = vpow2.f32 %v599_v21  ;;  %v393_v27 = vadd.f32 %v373_v57, %v324_v22  ;;  %v327_v28 = vpop.f32.mrb[14].mxu0 }
  0xf7   :  { %v600_v30 = vmul.f32 -1.442695, %v392_v25  ;;  %v328_v31 = vadd.f32 %v327_v28, %v182_v23  ;;  %v329_v32 = vpop.f32.mrb[15].mxu0  ;;  %643 = vtanh.f32 %v380_v20  ;;  %v465_v28 = vpop.permute.xlu0 %464 }
  0xf8   :  { %v601_v35 = vmul.f32 -1.442695, %v393_v27  ;;  %v330_v37 = vadd.f32 %v329_v32, %v184_v26  ;;  %v460_v27 = vld [vmem:[%s915_s6] sm:$0xff]  ;;  %s713_s6 = smov [#allocation2]  }
  0xf9   :  { %645 = vpow2.f32 %v600_v30  ;;  %v394_v34 = vadd.f32 %v378_v5, %v328_v31  ;;  %s570_s13 = sshll.u32 %s713_s6, 4  ;;  %s571_s13 = int_to_ptr.vmem [resolvable:$true] %s570_s13 }
  0xfa   :  { %647 = vpow2.f32 %v601_v35  ;;  %v395_v38 = vadd.f32 %v378_v5, %v330_v37  ;;  %s687_s1 = scalar_lea.vmem %s571_s13, 256  ;;  %p692_p1 = scmp.lt.s32.totalorder %s571_s13, %s571_s13 }
  0xfb   :  { %v636_v39 = vpop.eup %635  ;;  %649 = vtanh.f32 %v381_v29  ;;  %v602_v41 = vmul.f32 -1.442695, %v394_v34  ;;  %p688_p0 = scmp.ne.s32.totalorder %s571_s13, %s687_s1  ;;  %p693_p2 = scmp.lt.s32.totalorder %s687_s1, %s687_s1 }
  0xfc   :  { %v638_v43 = vpop.eup %637  ;;  %651 = vtanh.f32 %v382_v33  ;;  %v428_v44 = vadd.f32 1.0, %v636_v39  ;;  %v603_v45 = vmul.f32 -1.442695, %v395_v38  ;;  %v548_v39 = vld [vmem:[%s911_s2] sm:$0xff] }
  0xfd   :  { %v429_v49 = vadd.f32 1.0, %v638_v43  ;;  %653 = vpow2.f32 %v602_v41  ;;  %p694_p3 = por %p693_p2, %p692_p1 }
  0xfe   :  { %655 = vrcp.f32 %v428_v44 }
  0xff   :  { %v640_v40 = vpop.eup %639  ;;  %657 = vrcp.f32 %v429_v49  ;;  %p695_p4 = pnand %p694_p3, %p688_p0 }
 0x100   :  { %v642_v50 = vpop.eup %641  ;;  %v430_v52 = vadd.f32 1.0, %v640_v40  ;;  %659 = vpow2.f32 %v603_v45 }
 0x101   :  { %661 = vtanh.f32 %v383_v36  ;;  %v431_v56 = vadd.f32 1.0, %v642_v50  ;;  %v644_v57 = vpop.eup %643 }
 0x102   :  { %663 = vrcp.f32 %v430_v52 }
 0x103   :  { %v646_v59 = vpop.eup %645  ;;  %665 = vrcp.f32 %v431_v56 }
 0x104   :  { %v648_v42 = vpop.eup %647  ;;  %667 = vtanh.f32 %v384_v51  ;;  %v432_v60 = vadd.f32 1.0, %v646_v59 }
 0x105   :  { %v650_v61 = vpop.eup %649  ;;  %669 = vtanh.f32 %v385_v54  ;;  %v433_v63 = vadd.f32 1.0, %v648_v42 }
 0x106   :  { %v652_v46 = vpop.eup %651  ;;  %671 = vrcp.f32 %v432_v60 }
 0x107   :  { %v654_v0 = vpop.eup %653  ;;  %673 = vrcp.f32 %v433_v63 }
 0x108   :  { %v656_v1 = vpop.eup %655  ;;  %v434_v2 = vadd.f32 1.0, %v654_v0  ;;  %675 = vtanh.f32 %v386_v62 }
 0x109   :  { %v658_v3 = vpop.eup %657  ;;  %v452_v4 = vmul.f32 %v656_v1, %v644_v57 }
 0x10a   :  { %v660_v5 = vpop.eup %659  ;;  %677 = vrcp.f32 %v434_v2  ;;  %v453_v6 = vmul.f32 %v658_v3, %v650_v61 }
 0x10b   :  { %v662_v7 = vpop.eup %661  ;;  %v435_v8 = vadd.f32 1.0, %v660_v5  ;;  %679 = vtanh.f32 %v387_v48 }
 0x10c   :  { %v664_v9 = vpop.eup %663 }
 0x10d   :  { %v666_v53 = vpop.eup %665  ;;  %681 = vrcp.f32 %v435_v8  ;;  %v454_v10 = vmul.f32 %v664_v9, %v652_v46 }
 0x10e   :  { %v668_v11 = vpop.eup %667  ;;  %v455_v12 = vmul.f32 %v666_v53, %v662_v7 }
 0x10f   :  { %v670_v13 = vpop.eup %669  ;;  %v607_v14 = vpack.c.bf16 %v454_v10, %v452_v4 }
 0x110   :  { %v672_v15 = vpop.eup %671  ;;  %v605_v55 = vpack.c.bf16 %v455_v12, %v453_v6 }
 0x111   :  { %v674_v16 = vpop.eup %673  ;;  %v456_v17 = vmul.f32 %v672_v15, %v668_v11 }
 0x112   :  { %606 = vmatprep.subr.bf16.mxu1 %v605_v55  ;;  %v457_v18 = vmul.f32 %v674_v16, %v670_v13  ;;  %v676_v19 = vpop.eup %675 }
 0x113   :  { %608 = vmatpush1.bf16.msra.mxu1 %v607_v14 }
 0x114   :  { %v678_v20 = vpop.eup %677 }
 0x115   :  { %v458_v21 = vmul.f32 %v678_v20, %v676_v19  ;;  %v680_v22 = vpop.eup %679 }
 0x117   :  { %v682_v23 = vpop.eup %681  ;;  %v611_v24 = vpack.c.bf16 %v458_v21, %v456_v17 }
 0x118   :  { %v459_v25 = vmul.f32 %v682_v23, %v680_v22 }
 0x11a   :  { %v609_v26 = vpack.c.bf16 %v459_v25, %v457_v18 }
 0x11c   :  { %610 = vmatprep.subr.bf16.mxu1 %v609_v26 }
 0x11d   :  { %612 = vmatpush1.bf16.msra.mxu1 %v611_v24 }
 0x120   :  { %604 = vmatmul.mubr.msk.f32.vlgmr.msra.gmra.mrb[16].mxu1 %vm467_vm3, %v460_v27 }
 0x1f3   :  { %v537_v29 = vpop.f32.mrb[16].mxu1 }
 0x1f4   :  { %v538_v30 = vadd.f32 %v537_v29, %v465_v28  ;;  %v539_v31 = vpop.f32.mrb[17].mxu1 }
 0x1f5   :  { %v540_v32 = vadd.f32 %v539_v31, %v465_v28 }
 0x1f6   :  { %v542_v33 = vmul.f32 1.442695, %v538_v30  ;;  %546 = vst [vmem:[#allocation2] sm:$0xf] %v538_v30 }
 0x1f7   :  { %v544_v35 = vmul.f32 1.442695, %v540_v32  ;;  %547 = vst [vmem:[#allocation2 + $0x8] sm:$0xf] %v540_v32  ;;  %v556_v37 = vcombine.high %v538_v30, %v540_v32 }
 0x1f8   :  { %683 = vpow2.f32 %v542_v33 }
 0x1f9   :  { %685 = vpow2.f32 %v544_v35 }
 0x202   :  { %v684_v34 = vpop.eup %683 }
 0x203   :  { %v686_v38 = vpop.eup %685 }
 0x204   :  { %v551_v41 = vcombine.low %v684_v34, %v686_v38 }
 0x206   :  { %v553_v43 = vmul.f32 %v551_v41, %v548_v39 }
 0x208   :  { %v558_v44 = vadd.f32 %v556_v37, %v553_v43 }
 0x20a   :  { %563 = vst [vmem:[#allocation2 + $0x8] sm:$0xf0] %v558_v44  ;;  %v560_v45 = vcombine.low %v558_v44, %v558_v44 }
 0x20c   :  { %562 = vst [vmem:[#allocation2] sm:$0xf0] %v560_v45 }
 0x20d   :  { %698 = shalt.err (!%p695_p4)
}
 0x20e   :  { %s699_s2 = scalar_lea.hbm %s917_s8, 256 }
 0x20f   :  { %p700_p5 = scmp.ne.s32.totalorder %s917_s8, %s699_s2  ;;  %p703_p6 = scmp.lt.u32.totalorder %s699_s2, %s917_s8 }
 0x211   :  { %p705_p7 = pnand %p703_p6, %p700_p5 }
 0x213   :  { %708 = shalt.err (!%p705_p7)
}
 0x214   :  { %573 = dma.vmem_to_hbm [thread:$0]  %s571_s13, 256, %s917_s8, [#allocation3]  }
 0x215   :  { %709 = dma.done.wait [#allocation3], 256  }
 0x216   :  { %710 = vsyncadd [#allocation3], 4294967040 }
 0x217   :  { %577 = vsyncpa [#allocation3], 1 }

</bundles_post_ra>
